<compile_context>
chip_gen: v7x
topology: tpu7x:2x2x1
jax: 0.10.0
libtpu: 0.0.40
codegen_flags: <defaults>
</compile_context>

<pallas_src>
import functools

import jax
import jax.numpy as jnp
from jax.experimental import pallas as pl
from jax.experimental.pallas import tpu as pltpu


def _round_up(x, m):
    return ((x + m - 1) // m) * m


def _f1_ce_kernel(logits_ref, labels_ref, part_ref,
                  tp_acc, sp_acc, cnt_acc, ce_acc,
                  *, n_valid, tile_n, tiles_per_core):
    core = pl.program_id(0)
    t = pl.program_id(1)

    @pl.when(t == 0)
    def _init():
        tp_acc[...] = jnp.zeros_like(tp_acc)
        sp_acc[...] = jnp.zeros_like(sp_acc)
        cnt_acc[...] = jnp.zeros_like(cnt_acc)
        ce_acc[...] = jnp.zeros_like(ce_acc)

    logits = logits_ref[...]                       # (C, T) float32, classes on sublanes
    labels = labels_ref[...]                       # (1, T) int32
    c, tw = logits.shape

    # Global column offset of this tile (unclamped; index_map clamps the DMA).
    tile_start = (core * tiles_per_core + t) * tile_n
    col = jax.lax.broadcasted_iota(jnp.int32, (1, tw), 1) + tile_start
    valid_b = col < n_valid                        # (1, T) bool; all-True for clean tiles

    # Tail-safe labels: stale tail labels forced out of range so one-hot is
    # naturally zero there (no (C,T) mask multiply on the hot path).
    labels = jnp.where(valid_b, labels, -1)

    # Numerically stable softmax over the class (sublane) axis.
    col_max = jnp.max(logits, axis=0, keepdims=True)             # (1, T)
    exps = jnp.exp(logits - col_max)                             # (C, T)
    denom = jnp.sum(exps, axis=0, keepdims=True)                 # (1, T)
    inv = pl.reciprocal(denom)     # exact: N reciprocals, not N*C divides
    lse = col_max + jnp.log(denom)                               # (1, T)

    class_ids = jax.lax.broadcasted_iota(jnp.int32, (c, tw), 0)
    one_hot = (labels == class_ids).astype(jnp.float32)          # (C, T)

    # Zero padded columns AFTER the reciprocal via select, so any stale-VMEM
    # inf/NaN in the tail can never propagate into the accumulators.
    probs = jnp.where(valid_b, exps * inv, 0.0)                  # (C, T)

    # Cross-entropy partial sum: sum(logsumexp - logit[label]) over valid cols.
    true_logit = jnp.sum(one_hot * logits, axis=0, keepdims=True)   # (1, T)
    ce_term = jnp.where(valid_b, lse - true_logit, 0.0)             # (1, T)

    tp_acc[...] += jnp.sum(one_hot * probs, axis=1, keepdims=True)
    sp_acc[...] += jnp.sum(probs, axis=1, keepdims=True)
    cnt_acc[...] += jnp.sum(one_hot, axis=1, keepdims=True)
    ce_acc[...] += jnp.sum(ce_term, axis=1, keepdims=True)

    # Emit this core's raw partials once, on its last grid step.
    @pl.when(t == pl.num_programs(1) - 1)
    def _finalize():
        ce_col = jnp.broadcast_to(ce_acc[...], (c, 1))
        part_ref[...] = jnp.concatenate(
            [tp_acc[...], sp_acc[...], cnt_acc[...], ce_col], axis=1)[None]


def f1_loss_and_softmax(y_pred, y_true, *, num_classes, epsilon=1e-7, alpha=0.5,
                        max_tile_n=32768, pred_is_transposed=False):
    """Pallas TPU implementation of F1_loss_and_softmax.forward.

    y_pred: (N, num_classes) float32 logits, or (num_classes, N) if
            pred_is_transposed=True (preferred: avoids a transpose pass).
    y_true: (N,) integer class labels.
    returns: scalar float32 loss.
    """
    c = num_classes
    if pred_is_transposed:
        assert y_pred.ndim == 2 and y_pred.shape[0] == c
        n = y_pred.shape[1]
        logits_t = y_pred.astype(jnp.float32)
    else:
        assert y_pred.ndim == 2 and y_pred.shape[1] == c
        n = y_pred.shape[0]
        # Lane-dense layout: batch on the 128-lane axis, classes on sublanes.
        logits_t = jnp.transpose(y_pred.astype(jnp.float32))     # (C, N)
    assert y_true.ndim == 1 and y_true.shape[0] == n

    labels_2d = y_true.astype(jnp.int32).reshape(1, n)           # (1, N)

    # Tiling: big tiles amortize per-grid-step overhead; no wrapper padding —
    # the ragged last block is handled in-kernel with the validity mask.
    tile_n = min(_round_up(max_tile_n, 128), _round_up(n, 128))
    num_tiles = pl.cdiv(n, tile_n)
    num_cores = 2 if num_tiles >= 2 else 1     # v7x dual-TC split; serial elsewhere
    tiles_per_core = pl.cdiv(num_tiles, num_cores)

    def in_map(core, t):
        # Clamp so the (possibly) extra tile of the second core re-reads a valid
        # block; its contribution is zeroed by the in-kernel validity mask.
        return (0, jnp.minimum(core * tiles_per_core + t, num_tiles - 1))

    # VMEM budget: double-buffered input tiles + generous allowance for spilled
    # (C, T) intermediates.  Capped at 48 MiB (safe within v7x's 64 MiB VMEM).
    c_pad = _round_up(c, 8)
    logits_tile_bytes = c_pad * tile_n * 4
    labels_tile_bytes = 8 * tile_n * 4
    vmem_needed = 2 * (logits_tile_bytes + labels_tile_bytes) \
        + 14 * logits_tile_bytes + (2 << 20)
    vmem_limit = int(min(max(vmem_needed, 16 << 20), 48 << 20))

    kernel = functools.partial(_f1_ce_kernel, n_valid=n, tile_n=tile_n,
                               tiles_per_core=tiles_per_core)

    partials = pl.pallas_call(
        kernel,
        out_shape=jax.ShapeDtypeStruct((num_cores, c, 4), jnp.float32),
        grid_spec=pltpu.PrefetchScalarGridSpec(
            num_scalar_prefetch=0,
            grid=(num_cores, tiles_per_core),
            in_specs=[
                pl.BlockSpec((c, tile_n), in_map),
                pl.BlockSpec((1, tile_n), in_map),
            ],
            out_specs=pl.BlockSpec((1, c, 4), lambda core, t: (core, 0, 0)),
            scratch_shapes=[
                pltpu.VMEM((c, 1), jnp.float32),   # tp accumulator
                pltpu.VMEM((c, 1), jnp.float32),   # sum(probs) accumulator
                pltpu.VMEM((c, 1), jnp.float32),   # class-count accumulator
                pltpu.VMEM((1, 1), jnp.float32),   # CE partial sum
            ],
        ),
        compiler_params=pltpu.CompilerParams(
            dimension_semantics=("parallel", "arbitrary"),
            vmem_limit_bytes=vmem_limit,
        ),
    )(logits_t, labels_2d)

    # Tiny cross-core combine + F1/CE finalize in plain JAX (~30 flops).
    tp = jnp.sum(partials[:, :, 0], axis=0)        # (C,)
    sp = jnp.sum(partials[:, :, 1], axis=0)        # (C,)  tp + fp = sum(probs)
    cnt = jnp.sum(partials[:, :, 2], axis=0)       # (C,)  tp + fn = class count
    ce_sum = jnp.sum(partials[:, 0, 3])

    eps = jnp.float32(epsilon)
    precision = tp / (sp + eps)
    recall = tp / (cnt + eps)
    f1 = 2.0 * precision * recall / (precision + recall + eps)
    f1 = jnp.clip(f1, eps, 1.0 - eps)
    f1_loss = 1.0 - jnp.mean(f1)
    ce_loss = ce_sum / jnp.float32(n)
    return (1.0 - jnp.float32(alpha)) * f1_loss + jnp.float32(alpha) * ce_loss


def _reference_jax(y_pred, y_true, *, num_classes, epsilon=1e-7, alpha=0.5):
    """Pure-JAX reference mirroring the PyTorch module (for sanity check)."""
    y_pred = y_pred.astype(jnp.float32)
    one_hot = jax.nn.one_hot(y_true, num_classes, dtype=jnp.float32)
    probs = jax.nn.softmax(y_pred, axis=1)
    tp = jnp.sum(one_hot * probs, axis=0)
    fp = jnp.sum((1 - one_hot) * probs, axis=0)
    fn = jnp.sum(one_hot * (1 - probs), axis=0)
    precision = tp / (tp + fp + epsilon)
    recall = tp / (tp + fn + epsilon)
    f1 = 2 * precision * recall / (precision + recall + epsilon)
    f1 = jnp.clip(f1, epsilon, 1 - epsilon)
    f1_loss = 1 - jnp.mean(f1)
    lse = jax.scipy.special.logsumexp(y_pred, axis=1)
    true_logit = jnp.take_along_axis(y_pred, y_true[:, None], axis=1)[:, 0]
    ce = jnp.mean(lse - true_logit)
    return (1 - alpha) * f1_loss + alpha * ce


if __name__ == "__main__":
    NUM_CLASSES = 9
    BATCH = 8

    key = jax.random.PRNGKey(0)
    k_pred, k_true = jax.random.split(key)
    y_pred = jax.random.normal(k_pred, (BATCH, NUM_CLASSES), dtype=jnp.float32)
    y_true = jax.random.randint(k_true, (BATCH,), 0, NUM_CLASSES, dtype=jnp.int32)

    loss = f1_loss_and_softmax(y_pred, y_true, num_classes=NUM_CLASSES)
    loss = jax.block_until_ready(loss)
    ref = _reference_jax(y_pred, y_true, num_classes=NUM_CLASSES)
    assert jnp.allclose(loss, ref, rtol=1e-5, atol=1e-5), (loss, ref)

    # Multi-tile path: 300 valid rows, tile 128 -> 3 real tiles (ragged tail),
    # dual-core grid (2 x 2) with one fully-masked clamped tile on core 1.
    y_pred2 = jax.random.normal(k_pred, (300, NUM_CLASSES), dtype=jnp.float32)
    y_true2 = jax.random.randint(k_true, (300,), 0, NUM_CLASSES, dtype=jnp.int32)
    loss2 = f1_loss_and_softmax(y_pred2, y_true2, num_classes=NUM_CLASSES,
                                max_tile_n=128)
    loss2 = jax.block_until_ready(loss2)
    ref2 = _reference_jax(y_pred2, y_true2, num_classes=NUM_CLASSES)
    assert jnp.allclose(loss2, ref2, rtol=1e-5, atol=1e-5), (loss2, ref2)

    print("KERNEL_OK")
</pallas_src>

<mosaic_0001>
module attributes {stable_mosaic.version = 11 : i64} {
  func.func @_f1_ce_kernel(%arg0: i32, %arg1: i32, %arg2: memref<9x128xf32, #tpu.memory_space<vmem>>, %arg3: memref<1x128xi32, #tpu.memory_space<vmem>>, %arg4: memref<1x9x4xf32, #tpu.memory_space<vmem>>, %arg5: memref<9x1xf32, #tpu.memory_space<vmem>>, %arg6: memref<9x1xf32, #tpu.memory_space<vmem>>, %arg7: memref<9x1xf32, #tpu.memory_space<vmem>>, %arg8: memref<1x1xf32, #tpu.memory_space<vmem>>) attributes {dimension_semantics = [#tpu.dimension_semantics<parallel>, #tpu.dimension_semantics<arbitrary>], iteration_bounds = array<i64: 1, 1>, scalar_prefetch = 0 : i64, scratch_operands = 4 : i64, tpu.core_type = #tpu.core_type<tc>, window_params = [{transform_indices = @transform_0, window_bounds = array<i64: 9, 128>}, {transform_indices = @transform_1, window_bounds = array<i64: 1, 128>}, {transform_indices = @transform_2, window_bounds = array<i64: 1, 9, 4>}]} {
    %c0_i32 = arith.constant 0 : i32
    %0 = arith.cmpi eq, %arg1, %c0_i32 : i32
    %1 = arith.extui %0 : i1 to i32
    %c0_i32_0 = arith.constant 0 : i32
    %2 = arith.cmpi ne, %1, %c0_i32_0 : i32
    scf.if %2 {
      %cst_30 = arith.constant 0.000000e+00 : f32
      %66 = vector.broadcast %cst_30 : f32 to vector<9x1xf32>
      %c0_31 = arith.constant 0 : index
      %c0_32 = arith.constant 0 : index
      %67 = vector.load %arg5[%c0_31, %c0_32] : memref<9x1xf32, #tpu.memory_space<vmem>>, vector<9x1xf32>
      tpu.vector_store %arg5[%c0_31, %c0_32], %66 {strides = array<i32>} : memref<9x1xf32, #tpu.memory_space<vmem>>, vector<9x1xf32>,
      %cst_33 = arith.constant 0.000000e+00 : f32
      %68 = vector.broadcast %cst_33 : f32 to vector<9x1xf32>
      %c0_34 = arith.constant 0 : index
      %c0_35 = arith.constant 0 : index
      %69 = vector.load %arg6[%c0_34, %c0_35] : memref<9x1xf32, #tpu.memory_space<vmem>>, vector<9x1xf32>
      tpu.vector_store %arg6[%c0_34, %c0_35], %68 {strides = array<i32>} : memref<9x1xf32, #tpu.memory_space<vmem>>, vector<9x1xf32>,
      %cst_36 = arith.constant 0.000000e+00 : f32
      %70 = vector.broadcast %cst_36 : f32 to vector<9x1xf32>
      %c0_37 = arith.constant 0 : index
      %c0_38 = arith.constant 0 : index
      %71 = vector.load %arg7[%c0_37, %c0_38] : memref<9x1xf32, #tpu.memory_space<vmem>>, vector<9x1xf32>
      tpu.vector_store %arg7[%c0_37, %c0_38], %70 {strides = array<i32>} : memref<9x1xf32, #tpu.memory_space<vmem>>, vector<9x1xf32>,
      %cst_39 = arith.constant 0.000000e+00 : f32
      %72 = vector.broadcast %cst_39 : f32 to vector<1x1xf32>
      %c0_40 = arith.constant 0 : index
      %c0_41 = arith.constant 0 : index
      %73 = vector.load %arg8[%c0_40, %c0_41] : memref<1x1xf32, #tpu.memory_space<vmem>>, vector<1x1xf32>
      tpu.vector_store %arg8[%c0_40, %c0_41], %72 {strides = array<i32>} : memref<1x1xf32, #tpu.memory_space<vmem>>, vector<1x1xf32>,
    } else {
    }
    %c0 = arith.constant 0 : index
    %c0_1 = arith.constant 0 : index
    %3 = vector.load %arg2[%c0, %c0_1] : memref<9x128xf32, #tpu.memory_space<vmem>>, vector<9x128xf32>
    %c0_2 = arith.constant 0 : index
    %c0_3 = arith.constant 0 : index
    %4 = vector.load %arg3[%c0_2, %c0_3] : memref<1x128xi32, #tpu.memory_space<vmem>>, vector<1x128xi32>
    %c1_i32 = arith.constant 1 : i32
    %5 = arith.muli %arg0, %c1_i32 : i32
    %6 = arith.addi %5, %arg1 : i32
    %c128_i32 = arith.constant 128 : i32
    %7 = arith.muli %6, %c128_i32 : i32
    %8 = tpu.iota {dimensions = array<i32: 1>} : vector<1x128xi32>
    %9 = vector.broadcast %7 : i32 to vector<1x128xi32>
    %10 = arith.addi %8, %9 : vector<1x128xi32>
    %c8_i32 = arith.constant 8 : i32
    %11 = vector.broadcast %c8_i32 : i32 to vector<1x128xi32>
    %12 = arith.cmpi slt, %10, %11 : vector<1x128xi32>
    %c-1_i32 = arith.constant -1 : i32
    %13 = vector.broadcast %c-1_i32 : i32 to vector<1x128xi32>
    %14 = arith.select %12, %4, %13 : vector<1x128xi1>, vector<1x128xi32>
    %cst = arith.constant dense<0xFF800000> : vector<128xf32>
    %15 = vector.multi_reduction <maximumf>, %3, %cst [0] : vector<9x128xf32> to vector<128xf32>
    %16 = vector.shape_cast %15 : vector<128xf32> to vector<1x128xf32>
    %17 = vector.broadcast %16 : vector<1x128xf32> to vector<9x128xf32>
    %18 = arith.subf %3, %17 : vector<9x128xf32>
    %19 = math.exp %18 : vector<9x128xf32>
    %cst_4 = arith.constant dense<0.000000e+00> : vector<128xf32>
    %20 = vector.multi_reduction <add>, %19, %cst_4 [0] : vector<9x128xf32> to vector<128xf32>
    %21 = vector.shape_cast %20 : vector<128xf32> to vector<1x128xf32>
    %22 = tpu.reciprocal %21 : vector<1x128xf32> -> vector<1x128xf32>
    %23 = math.log %21 : vector<1x128xf32>
    %24 = arith.addf %16, %23 : vector<1x128xf32>
    %25 = tpu.iota {dimensions = array<i32: 0>} : vector<9x128xi32>
    %26 = vector.broadcast %14 : vector<1x128xi32> to vector<9x128xi32>
    %27 = arith.cmpi eq, %26, %25 : vector<9x128xi32>
    %28 = arith.extui %27 : vector<9x128xi1> to vector<9x128xi32>
    %29 = arith.sitofp %28 : vector<9x128xi32> to vector<9x128xf32>
    %30 = vector.broadcast %22 : vector<1x128xf32> to vector<9x128xf32>
    %31 = arith.mulf %19, %30 : vector<9x128xf32>
    %cst_5 = arith.constant 0.000000e+00 : f32
    %32 = vector.shape_cast %12 : vector<1x128xi1> to vector<1x128xi1>
    %33 = vector.broadcast %32 : vector<1x128xi1> to vector<9x128xi1>
    %34 = vector.broadcast %cst_5 : f32 to vector<9x128xf32>
    %35 = arith.select %33, %31, %34 : vector<9x128xi1>, vector<9x128xf32>
    %36 = arith.mulf %29, %3 : vector<9x128xf32>
    %cst_6 = arith.constant dense<0.000000e+00> : vector<128xf32>
    %37 = vector.multi_reduction <add>, %36, %cst_6 [0] : vector<9x128xf32> to vector<128xf32>
    %38 = vector.shape_cast %37 : vector<128xf32> to vector<1x128xf32>
    %39 = arith.subf %24, %38 : vector<1x128xf32>
    %cst_7 = arith.constant 0.000000e+00 : f32
    %40 = vector.broadcast %cst_7 : f32 to vector<1x128xf32>
    %41 = arith.select %12, %39, %40 : vector<1x128xi1>, vector<1x128xf32>
    %c0_8 = arith.constant 0 : index
    %c0_9 = arith.constant 0 : index
    %42 = vector.load %arg5[%c0_8, %c0_9] : memref<9x1xf32, #tpu.memory_space<vmem>>, vector<9x1xf32>
    %43 = arith.mulf %29, %35 : vector<9x128xf32>
    %cst_10 = arith.constant dense<0.000000e+00> : vector<9xf32>
    %44 = vector.multi_reduction <add>, %43, %cst_10 [1] : vector<9x128xf32> to vector<9xf32>
    %45 = vector.shape_cast %44 : vector<9xf32> to vector<9x1xf32>
    %46 = arith.addf %42, %45 : vector<9x1xf32>
    %c0_11 = arith.constant 0 : index
    %c0_12 = arith.constant 0 : index
    %47 = vector.load %arg5[%c0_11, %c0_12] : memref<9x1xf32, #tpu.memory_space<vmem>>, vector<9x1xf32>
    tpu.vector_store %arg5[%c0_11, %c0_12], %46 {strides = array<i32>} : memref<9x1xf32, #tpu.memory_space<vmem>>, vector<9x1xf32>,
    %c0_13 = arith.constant 0 : index
    %c0_14 = arith.constant 0 : index
    %48 = vector.load %arg6[%c0_13, %c0_14] : memref<9x1xf32, #tpu.memory_space<vmem>>, vector<9x1xf32>
    %cst_15 = arith.constant dense<0.000000e+00> : vector<9xf32>
    %49 = vector.multi_reduction <add>, %35, %cst_15 [1] : vector<9x128xf32> to vector<9xf32>
    %50 = vector.shape_cast %49 : vector<9xf32> to vector<9x1xf32>
    %51 = arith.addf %48, %50 : vector<9x1xf32>
    %c0_16 = arith.constant 0 : index
    %c0_17 = arith.constant 0 : index
    %52 = vector.load %arg6[%c0_16, %c0_17] : memref<9x1xf32, #tpu.memory_space<vmem>>, vector<9x1xf32>
    tpu.vector_store %arg6[%c0_16, %c0_17], %51 {strides = array<i32>} : memref<9x1xf32, #tpu.memory_space<vmem>>, vector<9x1xf32>,
    %c0_18 = arith.constant 0 : index
    %c0_19 = arith.constant 0 : index
    %53 = vector.load %arg7[%c0_18, %c0_19] : memref<9x1xf32, #tpu.memory_space<vmem>>, vector<9x1xf32>
    %cst_20 = arith.constant dense<0.000000e+00> : vector<9xf32>
    %54 = vector.multi_reduction <add>, %29, %cst_20 [1] : vector<9x128xf32> to vector<9xf32>
    %55 = vector.shape_cast %54 : vector<9xf32> to vector<9x1xf32>
    %56 = arith.addf %53, %55 : vector<9x1xf32>
    %c0_21 = arith.constant 0 : index
    %c0_22 = arith.constant 0 : index
    %57 = vector.load %arg7[%c0_21, %c0_22] : memref<9x1xf32, #tpu.memory_space<vmem>>, vector<9x1xf32>
    tpu.vector_store %arg7[%c0_21, %c0_22], %56 {strides = array<i32>} : memref<9x1xf32, #tpu.memory_space<vmem>>, vector<9x1xf32>,
    %c0_23 = arith.constant 0 : index
    %c0_24 = arith.constant 0 : index
    %58 = vector.load %arg8[%c0_23, %c0_24] : memref<1x1xf32, #tpu.memory_space<vmem>>, vector<1x1xf32>
    %cst_25 = arith.constant dense<0.000000e+00> : vector<1xf32>
    %59 = vector.multi_reduction <add>, %41, %cst_25 [1] : vector<1x128xf32> to vector<1xf32>
    %60 = vector.shape_cast %59 : vector<1xf32> to vector<1x1xf32>
    %61 = arith.addf %58, %60 : vector<1x1xf32>
    %c0_26 = arith.constant 0 : index
    %c0_27 = arith.constant 0 : index
    %62 = vector.load %arg8[%c0_26, %c0_27] : memref<1x1xf32, #tpu.memory_space<vmem>>, vector<1x1xf32>
    tpu.vector_store %arg8[%c0_26, %c0_27], %61 {strides = array<i32>} : memref<1x1xf32, #tpu.memory_space<vmem>>, vector<1x1xf32>,
    %c0_i32_28 = arith.constant 0 : i32
    %63 = arith.cmpi eq, %arg1, %c0_i32_28 : i32
    %64 = arith.extui %63 : i1 to i32
    %c0_i32_29 = arith.constant 0 : i32
    %65 = arith.cmpi ne, %64, %c0_i32_29 : i32
    scf.if %65 {
      %c0_30 = arith.constant 0 : index
      %c0_31 = arith.constant 0 : index
      %66 = vector.load %arg8[%c0_30, %c0_31] : memref<1x1xf32, #tpu.memory_space<vmem>>, vector<1x1xf32>
      %67 = vector.shape_cast %66 : vector<1x1xf32> to vector<1x1xf32>
      %68 = vector.broadcast %67 : vector<1x1xf32> to vector<9x1xf32>
      %c0_32 = arith.constant 0 : index
      %c0_33 = arith.constant 0 : index
      %69 = vector.load %arg5[%c0_32, %c0_33] : memref<9x1xf32, #tpu.memory_space<vmem>>, vector<9x1xf32>
      %c0_34 = arith.constant 0 : index
      %c0_35 = arith.constant 0 : index
      %70 = vector.load %arg6[%c0_34, %c0_35] : memref<9x1xf32, #tpu.memory_space<vmem>>, vector<9x1xf32>
      %c0_36 = arith.constant 0 : index
      %c0_37 = arith.constant 0 : index
      %71 = vector.load %arg7[%c0_36, %c0_37] : memref<9x1xf32, #tpu.memory_space<vmem>>, vector<9x1xf32>
      %72 = tpu.concatenate %69, %70, %71, %68 in 1 : vector<9x1xf32>, vector<9x1xf32>, vector<9x1xf32>, vector<9x1xf32> -> vector<9x4xf32>
      %73 = vector.shape_cast %72 : vector<9x4xf32> to vector<1x9x4xf32>
      %c0_38 = arith.constant 0 : index
      %c0_39 = arith.constant 0 : index
      %c0_40 = arith.constant 0 : index
      %74 = vector.load %arg4[%c0_38, %c0_39, %c0_40] : memref<1x9x4xf32, #tpu.memory_space<vmem>>, vector<1x9x4xf32>
      tpu.vector_store %arg4[%c0_38, %c0_39, %c0_40], %73 {strides = array<i32>} : memref<1x9x4xf32, #tpu.memory_space<vmem>>, vector<1x9x4xf32>,
    } else {
    }
    return
  }
  func.func @transform_0(%arg0: i32, %arg1: i32) -> (i32, i32) {
    %c1_i32 = arith.constant 1 : i32
    %0 = arith.muli %arg0, %c1_i32 : i32
    %1 = arith.addi %0, %arg1 : i32
    %c0_i32 = arith.constant 0 : i32
    %2 = arith.minsi %1, %c0_i32 : i32
    %c0_i32_0 = arith.constant 0 : i32
    %c0_i32_1 = arith.constant 0 : i32
    return %c0_i32_0, %2 : i32, i32
  }
  func.func @transform_1(%arg0: i32, %arg1: i32) -> (i32, i32) {
    %c1_i32 = arith.constant 1 : i32
    %0 = arith.muli %arg0, %c1_i32 : i32
    %1 = arith.addi %0, %arg1 : i32
    %c0_i32 = arith.constant 0 : i32
    %2 = arith.minsi %1, %c0_i32 : i32
    %c0_i32_0 = arith.constant 0 : i32
    %c0_i32_1 = arith.constant 0 : i32
    return %c0_i32_0, %2 : i32, i32
  }
  func.func @transform_2(%arg0: i32, %arg1: i32) -> (i32, i32, i32) {
    %c0_i32 = arith.constant 0 : i32
    %c0_i32_0 = arith.constant 0 : i32
    %c0_i32_1 = arith.constant 0 : i32
    return %arg0, %c0_i32, %c0_i32_0 : i32, i32, i32
  }
}

</mosaic_0001>

<bundles_post_ra>
// kernel: tpu_custom_call.1
= control target key start
LH: loop header
LB: loop body
LE: loop exit
PB: predicated region body
PF: predicated region fallthrough
CT: control target
= control target key end

     0   :  { %v80_v0 = vlaneseq  ;;  %vm86_vm0 = vcmask 1040384   ;;  %vm66_vm1 = vcmask 7168   ;;  %v260_v3 = vmov 0.0   ;;  %s263_s15 = smov 3   ;;  %s336_s0 = inlined_call_operand.vmem [shape: f32[9,8], index: 0, kind: input, shape index: {}]   ;;  %s337_s1 = inlined_call_operand.vmem [shape: s32[1,8], index: 1, kind: input, shape index: {}]   ;;  %s338_s2 = inlined_call_operand.vmem [shape: f32[1,9,4], index: 2, kind: output, shape index: {}]  }
   0x1   :  { %v75_v1 = vld [vmem:[%s336_s0] sm:$0xff]  ;;  %v76_v2 = vld [vmem:[%s336_s0 + $0x8] sm:$0x1]  ;;  %70 = vst.msk [vmem:[#allocation3] sm:$0xff] %vm66_vm1, %v260_v3  ;;  %67 = vst.msk [vmem:[#allocation2] sm:$0xff] %vm66_vm1, %v260_v3  ;;  %vm68_vm5 = vcmask 0  }
   0x2   :  { %72 = vst.msk [vmem:[#allocation4] sm:$0xff] %vm66_vm1, %v260_v3  ;;  %v291_v4 = vand.u32 127, %v80_v0  ;;  %v87_v5 = vsel %vm86_vm0, %v76_v2, -inf  ;;  %v77_v6 = vld [vmem:[%s337_s1] sm:$0x1]  ;;  %v114_v7 = vshrl.u32 %v80_v0, 7 }
   0x3   :  { %v88_v8 = vmax.f32 %v75_v1, %v87_v5  ;;  %71 = vst.msk [vmem:[#allocation3 + $0x8] sm:$0x1] %vm68_vm5, %v260_v3  ;;  %69 = vst.msk [vmem:[#allocation2 + $0x8] sm:$0x1] %vm68_vm5, %v260_v3  ;;  %s261_s0 = smov 1   ;;  %s262_s1 = smov 2  }
   0x4   :  { %vm84_vm2 = vcmp.lt.s32.totalorder %v291_v4, 8  ;;  %v118_v9 = vsub.s32 0, %v114_v7  ;;  %v115_v10 = vadd.s32 8, %v114_v7  ;;  %73 = vst.msk [vmem:[#allocation4 + $0x8] sm:$0x1] %vm68_vm5, %v260_v3  ;;  %vm222_vm6 = vcmask 15360  }
   0x5   :  { %v89_v11 = vrot.slane %v88_v8, 4  ;;  %v85_v12 = vsel %vm84_vm2, %v77_v6, 4294967295  ;;  %74 = vst.msk [vmem:[#allocation5] sm:$0x1] %vm68_vm5, %v260_v3  ;;  %vm225_vm7 = vcmask 23552   ;;  %vm228_vm8 = vcmask 31744  }
   0x6   :  { %v119_v13 = vrot.slane %v85_v12, %v118_v9  ;;  %vm230_vm9 = vcmask 24576  }
   0x7   :  { %v90_v14 = vmax.f32 %v88_v8, %v89_v11 }
   0x8   :  { %vm120_vm3 = vcmp.eq.s32.totalorder %v119_v13, %v114_v7  ;;  %vm121_vm4 = vcmp.eq.s32.totalorder %v119_v13, %v115_v10  ;;  %v144_v5 = vld [vmem:[#allocation2] sm:$0xff] }
   0x9   :  { %v91_v15 = vrot.slane %v90_v14, 2  ;;  %v245_v16 = vsel %vm120_vm3, 1.0, %v260_v3  ;;  %v246_v17 = vsel %vm121_vm4, 1.0, %v260_v3  ;;  %v170_v60 = vld [vmem:[#allocation4] sm:$0xff] }
   0xa   :  { %172 = vadd.xlane.f32.xlu1 %v245_v16  ;;  %v174_v19 = vsel %vm86_vm0, %v246_v17, 0.0  ;;  %v133_v26 = vmul.f32 %v246_v17, %v76_v2  ;;  %v132_v29 = vmul.f32 %v245_v16, %v75_v1  ;;  %v160_v7 = vld [vmem:[#allocation3 + $0x8] sm:$0x1] }
   0xb   :  { %v92_v18 = vmax.f32 %v90_v14, %v91_v15  ;;  %v171_v63 = vld [vmem:[#allocation4 + $0x8] sm:$0x1] }
   0xc   :  { %v134_v31 = vsel %vm86_vm0, %v133_v26, 0.0  ;;  %v181_v11 = vld [vmem:[#allocation5] sm:$0x1]  ;;  %v145_v15 = vld [vmem:[#allocation2 + $0x8] sm:$0x1] }
   0xd   :  { %v93_v20 = vrot.slane %v92_v18, 1  ;;  %v135_v34 = vadd.f32 %v134_v31, %v132_v29 }
   0xe   :  { %175 = vadd.xlane.f32.xlu1 %v174_v19 }
   0xf   :  { %v94_v21 = vmax.f32 %v92_v18, %v93_v20  ;;  %v136_v37 = vrot.slane %v135_v34, 4 }
  0x11   :  { %v95_v22 = vsub.f32 %v75_v1, %v94_v21  ;;  %v96_v23 = vsub.f32 %v76_v2, %v94_v21  ;;  %v137_v40 = vadd.f32 %v136_v37, %v135_v34  ;;  %v159_v2 = vld [vmem:[#allocation3] sm:$0xff] }
  0x13   :  { %v97_v24 = vmul.f32 1.442695, %v95_v22  ;;  %v99_v25 = vmul.f32 1.442695, %v96_v23  ;;  %v138_v42 = vrot.slane %v137_v40, 2 }
  0x15   :  { %252 = vpow2.f32 %v97_v24  ;;  %v139_v43 = vadd.f32 %v138_v42, %v137_v40 }
  0x16   :  { %254 = vpow2.f32 %v99_v25 }
  0x17   :  { %v140_v44 = vrot.slane %v139_v43, 1 }
  0x19   :  { %v141_v50 = vadd.f32 %v140_v44, %v139_v43 }
  0x1f   :  { %v253_v27 = vpop.eup %252 }
  0x20   :  { %v255_v28 = vpop.eup %254 }
  0x21   :  { %v101_v30 = vsel %vm86_vm0, %v255_v28, 0.0 }
  0x22   :  { %v102_v32 = vadd.f32 %v253_v27, %v101_v30 }
  0x24   :  { %v103_v33 = vrot.slane %v102_v32, 4 }
  0x26   :  { %v104_v35 = vadd.f32 %v103_v33, %v102_v32 }
  0x28   :  { %v105_v36 = vrot.slane %v104_v35, 2 }
  0x2a   :  { %v106_v38 = vadd.f32 %v105_v36, %v104_v35 }
  0x2c   :  { %v107_v39 = vrot.slane %v106_v38, 1 }
  0x2e   :  { %v108_v41 = vadd.f32 %v107_v39, %v106_v38 }
  0x30   :  { %256 = vrcp.f32 %v108_v41 }
  0x31   :  { %258 = vlog2.f32 %v108_v41 }
  0x3a   :  { %v257_v45 = vpop.eup %256 }
  0x3b   :  { %v259_v46 = vpop.eup %258  ;;  %v126_v47 = vmul.f32 %v257_v45, %v253_v27  ;;  %v127_v48 = vmul.f32 %v257_v45, %v255_v28 }
  0x3c   :  { %v111_v49 = vmul.f32 0.6931472, %v259_v46 }
  0x3d   :  { %v130_v51 = vsel %vm84_vm2, %v126_v47, 0.0  ;;  %v131_v52 = vsel %vm84_vm2, %v127_v48, 0.0 }
  0x3e   :  { %161 = vadd.xlane.f32.xlu0 %v130_v51  ;;  %v112_v53 = vadd.f32 %v111_v49, %v94_v21  ;;  %v146_v54 = vmul.f32 %v245_v16, %v130_v51  ;;  %v163_v55 = vsel %vm86_vm0, %v131_v52, 0.0  ;;  %v147_v58 = vmul.f32 %v246_v17, %v131_v52 }
  0x40   :  { %v142_v56 = vsub.f32 %v112_v53, %v141_v50  ;;  %148 = vadd.xlane.f32.xlu1 %v146_v54  ;;  %v150_v59 = vsel %vm86_vm0, %v147_v58, 0.0 }
  0x42   :  { %164 = vadd.xlane.f32.xlu0 %v163_v55  ;;  %v143_v57 = vsel %vm84_vm2, %v142_v56, 0.0 }
  0x46   :  { %182 = vadd.xlane.f32.xlu0 %v143_v57 }
  0x4a   :  { %151 = vadd.xlane.f32.xlu0 %v150_v59 }
  0x97   :  { %v173_v61 = vpop.xlane.xlu1 %172 }
  0x98   :  { %v177_v62 = vadd.f32 %v173_v61, %v170_v60 }
  0x9a   :  { %179 = vst.msk [vmem:[#allocation4] sm:$0xff] %vm66_vm1, %v177_v62 }
  0x9b   :  { %v176_v0 = vpop.xlane.xlu1 %175 }
  0x9c   :  { %v178_v1 = vadd.f32 %v176_v0, %v171_v63 }
  0x9e   :  { %180 = vst.msk [vmem:[#allocation4 + $0x8] sm:$0x1] %vm68_vm5, %v178_v1 }
  0xa1   :  { %v199_v16 = vld [vmem:[#allocation4] sm:$0xff] }
  0xa5   :  { %v200_v20 = vld [vmem:[#allocation4 + $0x8] sm:$0x1] }
  0xcb   :  { %v162_v4 = vpop.xlane.xlu0 %161 }
  0xcc   :  { %v166_v6 = vadd.f32 %v162_v4, %v159_v2 }
  0xcd   :  { %v149_v8 = vpop.xlane.xlu1 %148 }
  0xce   :  { %168 = vst.msk [vmem:[#allocation3] sm:$0xff] %vm66_vm1, %v166_v6  ;;  %v153_v9 = vadd.f32 %v149_v8, %v144_v5 }
  0xcf   :  { %v165_v3 = vpop.xlane.xlu0 %164 }
  0xd0   :  { %v167_v10 = vadd.f32 %v165_v3, %v160_v7  ;;  %156 = vst.msk [vmem:[#allocation2] sm:$0xff] %vm66_vm1, %v153_v9 }
  0xd2   :  { %169 = vst.msk [vmem:[#allocation3 + $0x8] sm:$0x1] %vm68_vm5, %v167_v10 }
  0xd3   :  { %v183_v12 = vpop.xlane.xlu0 %182 }
  0xd4   :  { %v184_v13 = vadd.f32 %v183_v12, %v181_v11 }
  0xd5   :  { %v197_v14 = vld [vmem:[#allocation3] sm:$0xff] }
  0xd6   :  { %203 = vrot.lane.b32.xlu1 %v197_v14, %s261_s0  ;;  %185 = vst.msk [vmem:[#allocation5] sm:$0x1] %vm68_vm5, %v184_v13 }
  0xd7   :  { %v152_v17 = vpop.xlane.xlu0 %151  ;;  %v195_v26 = vld [vmem:[#allocation2] sm:$0xff] }
  0xd8   :  { %v154_v18 = vadd.f32 %v152_v17, %v145_v15 }
  0xd9   :  { %v198_v19 = vld [vmem:[#allocation3 + $0x8] sm:$0x1] }
  0xda   :  { %211 = vrot.lane.b32.xlu1 %v199_v16, %s262_s1  ;;  %205 = vrot.lane.b32.xlu0 %v198_v19, %s261_s0  ;;  %158 = vst.msk [vmem:[#allocation2 + $0x8] sm:$0x1] %vm68_vm5, %v154_v18 }
  0xdd   :  { %v247_v21 = vld [vmem:[#allocation5] ss:$0 sm:$0xff] }
  0xde   :  { %213 = vrot.lane.b32.xlu1 %v200_v20, %s262_s1 }
  0xe1   :  { %v196_v24 = vld [vmem:[#allocation2 + $0x8] sm:$0x1] }
  0xe2   :  { %217 = vrot.lane.b32.xlu1 %v247_v21, %s263_s15 }
 0x148   :  { %v204_v22 = vpop.permute.xlu1 %203 }
 0x149   :  { %v220_v29 = vsel %vm66_vm1, %v195_v26, %v204_v22 }
 0x14c   :  { %v212_v23 = vpop.permute.xlu1 %211  ;;  %v206_v25 = vpop.permute.xlu0 %205 }
 0x14d   :  { %v221_v28 = vsel %vm66_vm1, %v196_v24, %v206_v25  ;;  %v223_v30 = vsel %vm222_vm6, %v220_v29, %v212_v23 }
 0x150   :  { %v214_v27 = vpop.permute.xlu1 %213 }
 0x151   :  { %v224_v31 = vsel %vm222_vm6, %v221_v28, %v214_v27 }
 0x154   :  { %v218_v32 = vpop.permute.xlu1 %217 }
 0x155   :  { %v226_v33 = vsel %vm225_vm7, %v223_v30, %v218_v32  ;;  %v227_v34 = vsel %vm225_vm7, %v224_v31, %v218_v32 }
 0x156   :  { %229 = vst.msk [vmem:[%s338_s2] sm:$0xff] %vm228_vm8, %v226_v33 }
 0x157   :  { %231 = vst.msk [vmem:[%s338_s2 + $0x8] sm:$0x1] %vm230_vm9, %v227_v34 }

</bundles_post_ra>
